<compile_context>
chip_gen: v7x
topology: tpu7x:2x2x1
jax: 0.10.0
libtpu: 0.0.40
codegen_flags: <defaults>
</compile_context>

<pallas_src>
import jax
import jax.numpy as jnp
from jax.experimental import pallas as pl
from jax.experimental.pallas import tpu as pltpu


_LANES = 512  # lane-dense last dim (multiple of 128) for the streamed-copy path


def _pick_tile_rows_and_vmem_limit():
    """Per-generation block sizing for the streamed-copy path (f32 budget)."""
    try:
        kind = jax.devices()[0].device_kind.lower()
    except Exception:  # defensive: never fail just because of a HW query
        kind = ""
    if ("v5" in kind) or ("v6" in kind):
        # 2048 x 512 f32 = 4 MiB/block; in + out double-buffering ~= 16 MiB,
        # so raise the scoped-VMEM limit explicitly (128 MiB physical VMEM).
        return 2048, 64 * 1024 * 1024
    # v7x (64 MiB VMEM shared by 2 TCs) and unknown chips: conservative
    # 1024 x 512 f32 = 2 MiB/block under the default scoped-VMEM limit.
    return 1024, None


def _copy_block_kernel(x_ref, o_ref):
    # Pure passthrough of the current lane-dense tile.
    o_ref[...] = x_ref[...]


def _streamed_copy(x2d, tile_rows, vmem_limit):
    """Lane-dense HBM->VMEM->HBM streamed copy, output aliased to the input."""
    rows = x2d.shape[0]
    if rows < 64:
        # Single block covering the whole (small) array: block == full array,
        # so the (8,128) divisibility constraint does not apply.
        tile = rows
    else:
        # At least 2 grid steps (pipeline overlap; shards across both v7x TCs),
        # tile rows a multiple of 8, capped at the VMEM-budgeted maximum.
        tile = min(tile_rows, 8 * pl.cdiv(pl.cdiv(rows, 2), 8))
    grid = (pl.cdiv(rows, tile),)  # ragged last block handled by Pallas masking

    params = dict(dimension_semantics=("parallel",))
    if vmem_limit is not None:
        params["vmem_limit_bytes"] = vmem_limit

    return pl.pallas_call(
        _copy_block_kernel,
        out_shape=jax.ShapeDtypeStruct(x2d.shape, x2d.dtype),
        grid=grid,
        in_specs=[pl.BlockSpec((tile, _LANES), lambda i: (i, 0))],
        out_specs=pl.BlockSpec((tile, _LANES), lambda i: (i, 0)),
        input_output_aliases={0: 0},  # in-place when the caller donates x
        compiler_params=pltpu.CompilerParams(**params),
    )(x2d)


def _dma_copy_kernel(x_ref, o_ref, sem):
    # Raw HBM->HBM DMA of the whole (untiled) array: one read + one write,
    # no VMEM staging, no padding/reshape; works for any shape and dtype.
    cp = pltpu.make_async_copy(x_ref, o_ref, sem)
    cp.start()
    cp.wait()


def _dma_copy(x):
    return pl.pallas_call(
        _dma_copy_kernel,
        out_shape=jax.ShapeDtypeStruct(x.shape, x.dtype),
        in_specs=[pl.BlockSpec(memory_space=pl.ANY)],
        out_specs=pl.BlockSpec(memory_space=pl.ANY),
        scratch_shapes=[pltpu.SemaphoreType.DMA],
    )(x)


def _pallas_identity_copy(x):
    """Materialized identity copy with exactly one HBM read + one HBM write."""
    total = x.size
    if total == 0:
        return x
    if total % _LANES == 0:
        tile_rows, vmem_limit = _pick_tile_rows_and_vmem_limit()
        rows = total // _LANES
        out2d = _streamed_copy(x.reshape(rows, _LANES), tile_rows, vmem_limit)
        return out2d.reshape(x.shape)
    # Ragged element counts: direct HBM->HBM DMA on the original shape (no
    # pad/slice/reshape passes).  Not aliased: a src==dst DMA would read and
    # write the same addresses concurrently.
    return _dma_copy(x)


def localizer_alexnet_robust_forward(x, *, materialize=False):
    """Forward pass of LocalizerAlexNetRobust: identity on an NCHW tensor.

    Default path returns x unchanged (zero HBM traffic — optimal on every TPU
    generation).  materialize=True forces a single-pass Pallas copy.
    """
    if not materialize:
        return x
    return _pallas_identity_copy(x)


if __name__ == "__main__":
    key = jax.random.PRNGKey(0)
    # Small NCHW input consistent with the module's conv-style expectation.
    x = jax.random.normal(key, (2, 4, 16, 16), dtype=jnp.float32)

    # Production path: pure identity (no HBM traffic).
    y_fast = jax.block_until_ready(localizer_alexnet_robust_forward(x))
    assert y_fast.shape == x.shape and y_fast.dtype == x.dtype
    assert bool(jnp.all(y_fast == x))

    # Pallas-materialized path (lane-dense streamed copy, single full block).
    y_copy = jax.block_until_ready(
        localizer_alexnet_robust_forward(x, materialize=True)
    )
    assert y_copy.shape == x.shape and y_copy.dtype == x.dtype
    assert bool(jnp.all(y_copy == x))

    # Multi-step pipelined path (>= 2 grid steps, aliased output).
    k2 = jax.random.PRNGKey(0)
    x_big = jax.random.normal(k2, (4, 64, 64, 64), dtype=jnp.float32)
    y_big = jax.block_until_ready(
        localizer_alexnet_robust_forward(x_big, materialize=True)
    )
    assert bool(jnp.all(y_big == x_big))

    # AlexNet-style odd shape (3x13x13): not a multiple of 512 elements, so it
    # takes the raw HBM->HBM DMA path (no pad, no slice, no reshape).
    k3 = jax.random.PRNGKey(0)
    x_odd = jax.random.normal(k3, (2, 3, 13, 13), dtype=jnp.float32)
    y_odd = jax.block_until_ready(
        localizer_alexnet_robust_forward(x_odd, materialize=True)
    )
    assert bool(jnp.all(y_odd == x_odd))

    # TODO(synk): the reference module has no layers (empty __init__) and
    # forward() is the identity, so there are no weights/conv/matmul to port.
    print("KERNEL_OK")
</pallas_src>

<mosaic_0001>
module attributes {stable_mosaic.version = 11 : i64} {
  func.func @_copy_block_kernel(%arg0: i32, %arg1: memref<4x512xf32, #tpu.memory_space<vmem>>, %arg2: memref<4x512xf32, #tpu.memory_space<vmem>>) attributes {dimension_semantics = [#tpu.dimension_semantics<parallel>], iteration_bounds = array<i64: 1>, scalar_prefetch = 0 : i64, scratch_operands = 0 : i64, tpu.core_type = #tpu.core_type<tc>, window_params = [{transform_indices = @transform_0, window_bounds = array<i64: 4, 512>}, {transform_indices = @transform_1, window_bounds = array<i64: 4, 512>}]} {
    %c0 = arith.constant 0 : index
    %c0_0 = arith.constant 0 : index
    %0 = vector.load %arg1[%c0, %c0_0] : memref<4x512xf32, #tpu.memory_space<vmem>>, vector<4x512xf32>
    %c0_1 = arith.constant 0 : index
    %c0_2 = arith.constant 0 : index
    %1 = vector.load %arg2[%c0_1, %c0_2] : memref<4x512xf32, #tpu.memory_space<vmem>>, vector<4x512xf32>
    tpu.vector_store %arg2[%c0_1, %c0_2], %0 {strides = array<i32>} : memref<4x512xf32, #tpu.memory_space<vmem>>, vector<4x512xf32>,
    return
  }
  func.func @transform_0(%arg0: i32) -> (i32, i32) {
    %c0_i32 = arith.constant 0 : i32
    %c0_i32_0 = arith.constant 0 : i32
    return %arg0, %c0_i32 : i32, i32
  }
  func.func @transform_1(%arg0: i32) -> (i32, i32) {
    %c0_i32 = arith.constant 0 : i32
    %c0_i32_0 = arith.constant 0 : i32
    return %arg0, %c0_i32 : i32, i32
  }
}

</mosaic_0001>

<bundles_post_ra>
// kernel: tpu_custom_call.1
= control target key start
LH: loop header
LB: loop body
LE: loop exit
PB: predicated region body
PF: predicated region fallthrough
CT: control target
= control target key end

     0   :  { %6 = vsyncpa [#allocation3], 0  ;;  %s126_s0 = inlined_call_operand.hbm [shape: f32[4,512], index: 0, kind: input, shape index: {}, may-alias: {0,1}]   ;;  %s127_s1 = inlined_call_operand.hbm [shape: f32[4,512], index: 1, kind: output, shape index: {}, may-alias: {0,1}]  }
   0x1   :  { %7 = vsyncpa [#allocation4], 0  ;;  %s90_s6 = smov [#allocation2]   ;;  %s42_s10 = scalar_lea.hbm %s126_s0, 256 }
   0x2   :  { %s14_s7 = sshll.u32 %s90_s6, 4  ;;  %p43_p0 = scmp.ne.s32.totalorder %s126_s0, %s42_s10  ;;  %s15_s7 = int_to_ptr.vmem [resolvable:$true] %s14_s7 }
   0x3   :  { %p46_p1 = scmp.lt.u32.totalorder %s42_s10, %s126_s0 }
   0x5   :  { %p48_p2 = pnand %p46_p1, %p43_p0 }
   0x7   :  { %51 = shalt.err (!%p48_p2)
}
   0x8   :  { %s52_s15 = scalar_lea.vmem %s15_s7, 256  ;;  %p57_p4 = scmp.lt.s32.totalorder %s15_s7, %s15_s7 }
   0x9   :  { %p53_p3 = scmp.ne.s32.totalorder %s15_s7, %s52_s15  ;;  %p58_p5 = scmp.lt.s32.totalorder %s52_s15, %s52_s15 }
   0xb   :  { %p59_p6 = por %p58_p5, %p57_p4 }
   0xd   :  { %p60_p7 = pnand %p59_p6, %p53_p3 }
   0xf   :  { %63 = shalt.err (!%p60_p7)
}
  0x10   :  { %17 = dma.hbm_to_vmem [thread:$0]  %s126_s0, 256, %s15_s7, [#allocation3]  }
  0x11   :  { %86 = dma.done.wait [#allocation3], 256  }
  0x12   :  { %87 = vsyncadd [#allocation3], 4294967040  ;;  %s91_s18 = smov [#allocation5]   ;;  %v21_v0 = vld [vmem:[#allocation2] sm:$0xff]  ;;  %v22_v1 = vld [vmem:[#allocation2 + $0x8] sm:$0xff] }
  0x13   :  { %s31_s19 = sshll.u32 %s91_s18, 4  ;;  %23 = vst [vmem:[#allocation5] sm:$0xff] %v21_v0  ;;  %24 = vst [vmem:[#allocation5 + $0x8] sm:$0xff] %v22_v1  ;;  %s32_s19 = int_to_ptr.vmem [resolvable:$true] %s31_s19 }
  0x14   :  { %s64_s20 = scalar_lea.vmem %s32_s19, 256  ;;  %p69_p9 = scmp.lt.s32.totalorder %s32_s19, %s32_s19 }
  0x15   :  { %p65_p8 = scmp.ne.s32.totalorder %s32_s19, %s64_s20  ;;  %p70_p10 = scmp.lt.s32.totalorder %s64_s20, %s64_s20 }
  0x17   :  { %p71_p11 = por %p70_p10, %p69_p9 }
  0x19   :  { %p72_p12 = pnand %p71_p11, %p65_p8 }
  0x1b   :  { %75 = shalt.err (!%p72_p12)
}
  0x1c   :  { %s76_s0 = scalar_lea.hbm %s127_s1, 256 }
  0x1d   :  { %p77_p13 = scmp.ne.s32.totalorder %s127_s1, %s76_s0  ;;  %p80_p0 = scmp.lt.u32.totalorder %s76_s0, %s127_s1 }
  0x1f   :  { %p82_p1 = pnand %p80_p0, %p77_p13 }
  0x21   :  { %85 = shalt.err (!%p82_p1)
}
  0x22   :  { %34 = dma.vmem_to_hbm [thread:$0]  %s32_s19, 256, %s127_s1, [#allocation4]  }
  0x23   :  { %88 = dma.done.wait [#allocation4], 256  }
  0x24   :  { %89 = vsyncadd [#allocation4], 4294967040 }
  0x25   :  { %38 = vsyncpa [#allocation3], 1 }
  0x26   :  { %39 = vsyncpa [#allocation4], 1 }

</bundles_post_ra>
